<compile_context>
chip_gen: v5e
topology: v5e:2x2
jax: 0.10.0
libtpu: 0.0.40
codegen_flags: <defaults>
</compile_context>

<pallas_src>
import functools

import jax
import jax.numpy as jnp
from jax import lax
from jax.experimental import pallas as pl
from jax.experimental.pallas import tpu as pltpu


def _round_up(v, m):
    return (v + m - 1) // m * m


def _int_pow(base, n):
    """base**n for a non-negative Python int n via VPU multiplies (no EUP)."""
    if n == 0:
        return jnp.ones_like(base)
    result = None
    b = base
    while n > 0:
        if n & 1:
            result = b if result is None else result * b
        n >>= 1
        if n:
            b = b * b
    return result


def _asl_kernel(x_ref, y_ref, out_ref, *, n_rows, tile_n, gamma_neg, gamma_pos,
                clip, eps, assume_binary_targets):
    x = x_ref[...].astype(jnp.float32)
    y = y_ref[...].astype(jnp.float32)

    # Exact sigmoid with a single EUP op: sigmoid(x) = 0.5*(tanh(x/2) + 1).
    xs_pos = 0.5 * (jnp.tanh(0.5 * x) + 1.0)
    xs_neg = 1.0 - xs_pos

    # Asymmetric clipping of the negative probability.
    if clip is not None and clip > 0:
        xs_neg = jnp.minimum(xs_neg + clip, 1.0)

    if assume_binary_targets:
        # y in {0,1}: y*log(p) + (1-y)*log(q) == log(select(y, p, q)); one log
        # per element instead of two.
        prob = jnp.where(y > 0.0, xs_pos, xs_neg)
        loss = jnp.log(jnp.maximum(prob, eps))
    else:
        los_pos = y * jnp.log(jnp.maximum(xs_pos, eps))
        los_neg = (1.0 - y) * jnp.log(jnp.maximum(xs_neg, eps))
        loss = los_pos + los_neg

    # Asymmetric focusing weight.
    if gamma_neg > 0 or gamma_pos > 0:
        pt = xs_pos * y + xs_neg * (1.0 - y)
        one_minus_pt = 1.0 - pt
        int_gammas = (float(gamma_pos).is_integer()
                      and float(gamma_neg).is_integer())
        if assume_binary_targets and int_gammas:
            # VPU-only integer powers + select; exact for binary targets.
            w_pos = _int_pow(one_minus_pt, int(gamma_pos))
            w_neg = _int_pow(one_minus_pt, int(gamma_neg))
            one_sided_w = jnp.where(y > 0.0, w_pos, w_neg)
        else:
            # General path (soft targets and/or non-integer gammas).
            one_sided_gamma = gamma_pos * y + gamma_neg * (1.0 - y)
            one_sided_w = jnp.power(one_minus_pt, one_sided_gamma)
        loss = loss * one_sided_w

    # Mask rows past N (only the last grid step when tile_n does not divide N):
    # the out-of-bounds portion of the input block holds garbage, so force its
    # contribution to exactly zero.  One VPU compare + select per element.
    row = (pl.program_id(0) * tile_n
           + lax.broadcasted_iota(jnp.int32, (tile_n, 1), 0))
    loss = jnp.where(row < n_rows, loss, 0.0)

    # Partial reduce down to a sublane-aligned (8, C) slab: pure vreg adds
    # (no cross-sublane XLU step), unmasked lane-dense store.
    c = loss.shape[-1]
    out_ref[...] = jnp.sum(loss.reshape(tile_n // 8, 8, c), axis=0)


def asymmetric_loss(x, y, *, gamma_neg=4, gamma_pos=0, clip=0.05, eps=1e-8,
                    assume_binary_targets=True, tile_n=None,
                    max_block_bytes=2 * 1024 * 1024,
                    vmem_limit_bytes=48 * 1024 * 1024):
    """Pallas TPU implementation of AsymmetricLoss.forward -> scalar f32.

    assume_binary_targets=True (default) assumes y is a 0/1 binarized vector
    (as in the PyTorch docstring) and enables single-log + integer-power
    fast paths that are exact in that case; set False for soft targets.
    """
    assert x.shape == y.shape and x.ndim == 2
    N, C = x.shape

    if tile_n is None:
        # Size the row tile by the actual input itemsize, capped so that each
        # input block is <= max_block_bytes (2 inputs x 2 pipeline buffers x
        # 2 MiB = 8 MiB, plus a handful of block-sized f32 temporaries, stays
        # well inside the 48 MiB scoped-VMEM limit on every generation), and
        # so that the grid has at least 2 steps (v7x megacore balance).
        itemsize = max(jnp.dtype(x.dtype).itemsize, jnp.dtype(y.dtype).itemsize)
        bytes_per_row = max(1, C * itemsize)
        rows_budget = max(8, (max_block_bytes // bytes_per_row) // 8 * 8)
        balanced = _round_up(pl.cdiv(N, 2), 8)
        tile_n = max(8, min(rows_budget, balanced))
    tile_n = max(8, (tile_n // 8) * 8)

    num_blocks = pl.cdiv(N, tile_n)

    kernel = functools.partial(
        _asl_kernel,
        n_rows=N,
        tile_n=tile_n,
        gamma_neg=float(gamma_neg),
        gamma_pos=float(gamma_pos),
        clip=clip,
        eps=float(eps),
        assume_binary_targets=assume_binary_targets,
    )

    partials = pl.pallas_call(
        kernel,
        out_shape=jax.ShapeDtypeStruct((num_blocks * 8, C), jnp.float32),
        grid_spec=pltpu.PrefetchScalarGridSpec(
            num_scalar_prefetch=0,
            grid=(num_blocks,),
            in_specs=[
                pl.BlockSpec((tile_n, C), lambda i: (i, 0)),
                pl.BlockSpec((tile_n, C), lambda i: (i, 0)),
            ],
            out_specs=pl.BlockSpec((8, C), lambda i: (i, 0)),
        ),
        compiler_params=pltpu.CompilerParams(
            dimension_semantics=("parallel",),
            vmem_limit_bytes=vmem_limit_bytes),
    )(x, y)

    # Tiny final reduction ((num_blocks*8) x C floats) + negation in JAX.
    return -jnp.sum(partials)


def _asl_reference(x, y, gamma_neg=4, gamma_pos=0, clip=0.05, eps=1e-8):
    """Pure-JAX reference mirroring the PyTorch forward exactly."""
    x = x.astype(jnp.float32)
    y = y.astype(jnp.float32)
    xs_pos = jax.nn.sigmoid(x)
    xs_neg = 1.0 - xs_pos
    xs_neg = jnp.minimum(xs_neg + clip, 1.0)
    los_pos = y * jnp.log(jnp.maximum(xs_pos, eps))
    los_neg = (1.0 - y) * jnp.log(jnp.maximum(xs_neg, eps))
    loss = los_pos + los_neg
    pt = xs_pos * y + xs_neg * (1.0 - y)
    gamma = gamma_pos * y + gamma_neg * (1.0 - y)
    loss = loss * jnp.power(1.0 - pt, gamma)
    return -jnp.sum(loss)


if __name__ == "__main__":
    key = jax.random.PRNGKey(0)
    kx, ky, kx2, ky2, kx3, ky3 = jax.random.split(key, 6)

    # Case 1: binary multi-label, batch=32, num_classes=128 (2 grid steps).
    x1 = jax.random.normal(kx, (32, 128), dtype=jnp.float32) * 2.0
    y1 = (jax.random.uniform(ky, (32, 128)) < 0.1).astype(jnp.float32)
    loss1 = jax.block_until_ready(asymmetric_loss(x1, y1))
    ref1 = jax.block_until_ready(_asl_reference(x1, y1))
    assert jnp.isfinite(loss1), "non-finite loss (case 1)"
    assert jnp.allclose(loss1, ref1, rtol=1e-4, atol=1e-3), (loss1, ref1)

    # Case 2: batch not a multiple of the tile (exercises in-kernel tail
    # masking), bf16 logits and bf16 0/1 targets (HBM-traffic reduction path).
    x2 = (jax.random.normal(kx2, (50, 256), dtype=jnp.float32) * 2.0
          ).astype(jnp.bfloat16)
    y2 = (jax.random.uniform(ky2, (50, 256)) < 0.1).astype(jnp.bfloat16)
    loss2 = jax.block_until_ready(asymmetric_loss(x2, y2))
    ref2 = jax.block_until_ready(_asl_reference(x2, y2))
    assert jnp.isfinite(loss2), "non-finite loss (case 2)"
    assert jnp.allclose(loss2, ref2, rtol=1e-4, atol=1e-3), (loss2, ref2)

    # Case 3: soft targets -> general (two-log, tensor-exponent pow) path.
    x3 = jax.random.normal(kx3, (24, 128), dtype=jnp.float32) * 2.0
    y3 = jax.random.uniform(ky3, (24, 128), dtype=jnp.float32)
    loss3 = jax.block_until_ready(
        asymmetric_loss(x3, y3, assume_binary_targets=False))
    ref3 = jax.block_until_ready(_asl_reference(x3, y3))
    assert jnp.isfinite(loss3), "non-finite loss (case 3)"
    assert jnp.allclose(loss3, ref3, rtol=1e-4, atol=1e-3), (loss3, ref3)

    print("KERNEL_OK")
</pallas_src>

<mosaic_0001>
module attributes {stable_mosaic.version = 11 : i64} {
  func.func @_asl_kernel(%arg0: i32, %arg1: memref<16x128xf32, #tpu.memory_space<vmem>>, %arg2: memref<16x128xf32, #tpu.memory_space<vmem>>, %arg3: memref<8x128xf32, #tpu.memory_space<vmem>>) attributes {dimension_semantics = [#tpu.dimension_semantics<parallel>], iteration_bounds = array<i64: 2>, scalar_prefetch = 0 : i64, scratch_operands = 0 : i64, tpu.core_type = #tpu.core_type<tc>, window_params = [{transform_indices = @transform_0, window_bounds = array<i64: 16, 128>}, {transform_indices = @transform_1, window_bounds = array<i64: 16, 128>}, {transform_indices = @transform_2, window_bounds = array<i64: 8, 128>}]} {
    %c0 = arith.constant 0 : index
    %c0_0 = arith.constant 0 : index
    %0 = vector.load %arg1[%c0, %c0_0] : memref<16x128xf32, #tpu.memory_space<vmem>>, vector<16x128xf32>
    %c0_1 = arith.constant 0 : index
    %c0_2 = arith.constant 0 : index
    %1 = vector.load %arg2[%c0_1, %c0_2] : memref<16x128xf32, #tpu.memory_space<vmem>>, vector<16x128xf32>
    %cst = arith.constant 5.000000e-01 : f32
    %2 = vector.broadcast %cst : f32 to vector<16x128xf32>
    %3 = arith.mulf %2, %0 : vector<16x128xf32>
    %4 = math.tanh %3 : vector<16x128xf32>
    %cst_3 = arith.constant 1.000000e+00 : f32
    %5 = vector.broadcast %cst_3 : f32 to vector<16x128xf32>
    %6 = arith.addf %4, %5 : vector<16x128xf32>
    %cst_4 = arith.constant 5.000000e-01 : f32
    %7 = vector.broadcast %cst_4 : f32 to vector<16x128xf32>
    %8 = arith.mulf %7, %6 : vector<16x128xf32>
    %cst_5 = arith.constant 1.000000e+00 : f32
    %9 = vector.broadcast %cst_5 : f32 to vector<16x128xf32>
    %10 = arith.subf %9, %8 : vector<16x128xf32>
    %cst_6 = arith.constant 5.000000e-02 : f32
    %11 = vector.broadcast %cst_6 : f32 to vector<16x128xf32>
    %12 = arith.addf %10, %11 : vector<16x128xf32>
    %cst_7 = arith.constant 1.000000e+00 : f32
    %13 = vector.broadcast %cst_7 : f32 to vector<16x128xf32>
    %14 = arith.minimumf %12, %13 : vector<16x128xf32>
    %cst_8 = arith.constant 0.000000e+00 : f32
    %15 = vector.broadcast %cst_8 : f32 to vector<16x128xf32>
    %16 = arith.cmpf ogt, %1, %15 : vector<16x128xf32>
    %17 = arith.select %16, %8, %14 : vector<16x128xi1>, vector<16x128xf32>
    %cst_9 = arith.constant 9.99999993E-9 : f32
    %18 = vector.broadcast %cst_9 : f32 to vector<16x128xf32>
    %19 = arith.maximumf %17, %18 : vector<16x128xf32>
    %20 = math.log %19 : vector<16x128xf32>
    %21 = arith.mulf %8, %1 : vector<16x128xf32>
    %cst_10 = arith.constant 1.000000e+00 : f32
    %22 = vector.broadcast %cst_10 : f32 to vector<16x128xf32>
    %23 = arith.subf %22, %1 : vector<16x128xf32>
    %24 = arith.mulf %14, %23 : vector<16x128xf32>
    %25 = arith.addf %21, %24 : vector<16x128xf32>
    %cst_11 = arith.constant 1.000000e+00 : f32
    %26 = vector.broadcast %cst_11 : f32 to vector<16x128xf32>
    %27 = arith.subf %26, %25 : vector<16x128xf32>
    %cst_12 = arith.constant 1.000000e+00 : f32
    %28 = vector.broadcast %cst_12 : f32 to vector<16x128xf32>
    %29 = arith.mulf %27, %27 : vector<16x128xf32>
    %30 = arith.mulf %29, %29 : vector<16x128xf32>
    %cst_13 = arith.constant 0.000000e+00 : f32
    %31 = vector.broadcast %cst_13 : f32 to vector<16x128xf32>
    %32 = arith.cmpf ogt, %1, %31 : vector<16x128xf32>
    %33 = arith.select %32, %28, %30 : vector<16x128xi1>, vector<16x128xf32>
    %34 = arith.mulf %20, %33 : vector<16x128xf32>
    %c16_i32 = arith.constant 16 : i32
    %35 = arith.muli %arg0, %c16_i32 : i32
    %36 = tpu.iota {dimensions = array<i32: 0>} : vector<16x1xi32>
    %37 = vector.broadcast %35 : i32 to vector<16x1xi32>
    %38 = arith.addi %37, %36 : vector<16x1xi32>
    %c32_i32 = arith.constant 32 : i32
    %39 = vector.broadcast %c32_i32 : i32 to vector<16x1xi32>
    %40 = arith.cmpi slt, %38, %39 : vector<16x1xi32>
    %cst_14 = arith.constant 0.000000e+00 : f32
    %41 = vector.shape_cast %40 : vector<16x1xi1> to vector<16x1xi1>
    %42 = vector.broadcast %41 : vector<16x1xi1> to vector<16x128xi1>
    %43 = vector.broadcast %cst_14 : f32 to vector<16x128xf32>
    %44 = arith.select %42, %34, %43 : vector<16x128xi1>, vector<16x128xf32>
    %45 = vector.shape_cast %44 : vector<16x128xf32> to vector<2x8x128xf32>
    %cst_15 = arith.constant dense<0.000000e+00> : vector<8x128xf32>
    %46 = vector.multi_reduction <add>, %45, %cst_15 [0] : vector<2x8x128xf32> to vector<8x128xf32>
    %c0_16 = arith.constant 0 : index
    %c0_17 = arith.constant 0 : index
    %47 = vector.load %arg3[%c0_16, %c0_17] : memref<8x128xf32, #tpu.memory_space<vmem>>, vector<8x128xf32>
    tpu.vector_store %arg3[%c0_16, %c0_17], %46 {strides = array<i32>} : memref<8x128xf32, #tpu.memory_space<vmem>>, vector<8x128xf32>,
    return
  }
  func.func @transform_0(%arg0: i32) -> (i32, i32) {
    %c0_i32 = arith.constant 0 : i32
    %c0_i32_0 = arith.constant 0 : i32
    return %arg0, %c0_i32 : i32, i32
  }
  func.func @transform_1(%arg0: i32) -> (i32, i32) {
    %c0_i32 = arith.constant 0 : i32
    %c0_i32_0 = arith.constant 0 : i32
    return %arg0, %c0_i32 : i32, i32
  }
  func.func @transform_2(%arg0: i32) -> (i32, i32) {
    %c0_i32 = arith.constant 0 : i32
    %c0_i32_0 = arith.constant 0 : i32
    return %arg0, %c0_i32 : i32, i32
  }
}

</mosaic_0001>

<bundles_post_ra>
// kernel: tpu_custom_call.1
= control target key start
LH: loop header
LB: loop body
LE: loop exit
PB: predicated region body
PF: predicated region fallthrough
CT: control target
= control target key end

     0   :  { %7 = vsyncpa [#allocation3], 0  ;;  %s784_s0 = inlined_call_operand.hbm [shape: f32[32,128], index: 0, kind: input, shape index: {}]   ;;  %s785_s1 = inlined_call_operand.hbm [shape: f32[32,128], index: 1, kind: input, shape index: {}]   ;;  %s786_s2 = inlined_call_operand.hbm [shape: f32[16,128], index: 2, kind: output, shape index: {}]  }
   0x1   :  { %9 = vsyncpa [#allocation3 + $0x1], 0 }
   0x2   :  { %10 = vsyncpa [#allocation6], 0 }
   0x3   :  { %12 = vsyncpa [#allocation6 + $0x1], 0 }
   0x4   :  { %13 = vsyncpa [#allocation4], 0 }
   0x5   :  { %15 = vsyncpa [#allocation4 + $0x1], 0  ;;  %s610_s9 = smov 0   ;;  %s612_s10 = smov 0  }
   0x6   :  { %s614_s11 = smov 0   ;;  %s616_s12 = smov 0  }
   0x7 LB: > { %s631_s13 = sadd.s32 4294967295, %s591_s12   ;;  %s380_s14 = sadd.s32 4294967294, %s591_s12   ;;  %s591_s12 = sphi %s616_s12, %s797_s12   ;;  %s587_s11 = sphi %s614_s11, %s796_s11   ;;  %s583_s10 = sphi %s612_s10, %s795_s10   ;;  %s579_s9 = sphi %s610_s9, %s794_s9  }
   0x8   : > { %s635_s15 = sadd.s32 1, %s591_s12   ;;  %s28_s16 = sadd.s32 1, %s587_s11 }
   0x9   : > { %s25_s17 = ssub.s32 %s591_s12, %s635_s15  ;;  %p35_p0 = scmp.ne.s32.totalorder %s587_s11, %s583_s10 }
   0xa   : > { %p26_p1 = scmp.eq.s32.totalorder %s25_s17, 0  ;;  %p36_p2 = scmp.eq.s32.totalorder %s591_s12, 0 }
   0xb   : > { %p41_p3 = scmp.ne.s32.totalorder %s583_s10, %s579_s9  ;;  %p42_p4 = scmp.eq.s32.totalorder %s631_s13, 0 }
   0xc   : > { %s647_s18 = scalar_select %p26_p1, %s587_s11, %s28_s16  }
   0xd   : > { %p649_p5 = por %p36_p2, %p35_p0  ;;  %p653_p6 = por %p42_p4, %p41_p3 }
   0xe   : > { %p91_p7 = scmp.eq.s32.totalorder %s631_s13, 1  ;;  %p97_p8 = scmp.eq.s32.totalorder %s380_s14, 1 }
   0xf   : > { %p417_p10 = scmp.lt.s32.totalorder %s591_s12, 2  ;;  %s669_s23 = sand.u32 1, %s587_s11  }
  0x10   : > { %p660_p11 = por %p91_p7, %p35_p0  ;;  %p664_p12 = por %p97_p8, %p41_p3 }
  0x11   : > { %s398_s24 = sshll.u32 %s591_s12, 4  ;;  %s383_s25 = sshll.u32 %s669_s23, 4 }
  0x12   : > { %s126_s28 = scalar_lea.hbm %s784_s0, %s398_s24  ;;  %s121_s30 = scalar_lea.vmem [#allocation2], %s383_s25 }
  0x13   : > { %s127_s29 = sshll.u32 %s126_s28, 4  ;;  %s129_s3 = sshll.u32 %s121_s30, 4  ;;  %s128_s29 = int_to_ptr.hbm [resolvable:$true] %s127_s29  ;;  %s130_s3 = int_to_ptr.vmem [resolvable:$true] %s129_s3 }
  0x14   : > { %p682_p13 = pnand %p417_p10, %p649_p5  ;;  %p389_p0 = scmp.ge.s32.totalorder %s591_s12, 1 }
  0x15   : > { %p159_p1 = scmp.lt.s32.totalorder %s591_s12, 3  ;;  %s118_s5 = scalar_lea.sflag [#allocation3], %s669_s23 }
  0x16   : > { %s461_s6 = sshra.s32 %s128_s29, 4  ;;  %p465_p3 = pneg %p682_p13  ;;  %s462_s6 = int_to_ptr.hbm [resolvable:$true] %s461_s6 }
  0x17   : > { %s463_s7 = scalar_lea.hbm %s462_s6, 16  ;;  %s468_s16 = scalar_lea.hbm %s784_s0, 32 }
  0x18   : > { %p464_p2 = scmp.ne.s32.totalorder %s462_s6, %s463_s7  ;;  %p469_p5 = scmp.lt.s32.totalorder %s462_s6, %s784_s0 }
  0x19   : > { %p470_p8 = scmp.lt.s32.totalorder %s468_s16, %s463_s7 }
  0x1a   : > { %p466_p4 = pnand %p465_p3, %p464_p2 }
  0x1b   : > { %p471_p10 = por %p470_p8, %p469_p5 }
  0x1c   : > { %p467_p7 = pneg %p466_p4 }
  0x1e   : > { %p472_p9 = pnand %p471_p10, %p467_p7 }
  0x20   : > { %475 = shalt.err (!%p472_p9)
}
  0x21   : > { %s593_s26 = smov 128   ;;  %s594_s27 = smov 8  }
  0x22   : > { %409 = dma.hbm_to_vmem [thread:$0]  (!%p682_p13), %s128_s29, 256, %s130_s3, %s118_s5, %s593_s26, %s593_s26, %s594_s27  }
  0x23   : > { %p706_p2 = pnand %p389_p0, %p159_p1  ;;  %s148_s7 = scalar_lea.hbm %s785_s1, %s398_s24 }
  0x24   : > { %s149_s8 = sshll.u32 %s148_s7, 4  ;;  %s143_s14 = scalar_lea.vmem [#allocation5], %s383_s25  ;;  %s150_s8 = int_to_ptr.hbm [resolvable:$true] %s149_s8 }
  0x25   : > { %s151_s16 = sshll.u32 %s143_s14, 4  ;;  %s140_s17 = scalar_lea.sflag [#allocation6], %s669_s23  ;;  %s152_s16 = int_to_ptr.vmem [resolvable:$true] %s151_s16 }
  0x26   : > { %s491_s19 = sshra.s32 %s150_s8, 4  ;;  %s498_s30 = scalar_lea.hbm %s785_s1, 32  ;;  %s492_s19 = int_to_ptr.hbm [resolvable:$true] %s491_s19 }
  0x27   : > { %s493_s29 = scalar_lea.hbm %s492_s19, 16  ;;  %p499_p4 = scmp.lt.s32.totalorder %s492_s19, %s785_s1 }
  0x28   : > { %p494_p9 = scmp.ne.s32.totalorder %s492_s19, %s493_s29  ;;  %p500_p7 = scmp.lt.s32.totalorder %s498_s30, %s493_s29 }
  0x2a   : > { %p496_p0 = pnand %p494_p9, %p465_p3  ;;  %p501_p5 = por %p500_p7, %p499_p4 }
  0x2c   : > { %p497_p1 = pneg %p496_p0 }
  0x2e   : > { %p502_p8 = pnand %p501_p5, %p497_p1 }
  0x30   : > { %505 = shalt.err (!%p502_p8)
}
  0x31   : > { %412 = dma.hbm_to_vmem [thread:$0]  (!%p682_p13), %s150_s8, 256, %s152_s16, %s140_s17, %s593_s26, %s593_s26, %s594_s27  }
  0x32   : > { %163 = sbr.rel (%p706_p2) target bundleno = 99 (0x63), region = 28  ;;  %s732_s23 = sand.u32 (!%p706_p2), 1, %s583_s10  }
  0x33   : > { %s390_s25 = sshll.u32 (!%p706_p2), %s732_s23, 4  ;;  %s166_s7 = scalar_lea.sflag (!%p706_p2), [#allocation3], %s732_s23 }
  0x34   : > { %s169_s14 = scalar_lea.vmem (!%p706_p2), [#allocation2], %s390_s25 }
  0x37   : > { %566 = dma.done.wait (%p653_p6), %s166_s7, 256  }
  0x38   : > { %568 = vsyncadd (%p653_p6), %s166_s7, 4294967040  ;;  %s176_s4 = scalar_lea.sflag [#allocation6], %s732_s23  ;;  %s179_s26 = scalar_lea.vmem [#allocation5], %s390_s25 }
  0x39   : > { %570 = dma.done.wait (%p653_p6), %s176_s4, 256  }
  0x3a   : > { %572 = vsyncadd (%p653_p6), %s176_s4, 4294967040  ;;  %v208_v0 = vld [vmem:[%s169_s14] sm:$0xff]  ;;  %v209_v1 = vld [vmem:[%s169_s14 + $0x8] sm:$0xff]  ;;  %v255_v16 = vlaneseq  ;;  %s393_s20 = sshll.u32 %s631_s13, 4  ;;  %s392_s27 = sshll.u32 %s732_s23, 3 }
  0x3b   : > { %v212_v2 = vmul.f32 0.5, %v208_v0  ;;  %v213_v3 = vmul.f32 0.5, %v209_v1  ;;  %v210_v9 = vld [vmem:[%s179_s26] sm:$0xff]  ;;  %v211_v11 = vld [vmem:[%s179_s26 + $0x8] sm:$0xff]  ;;  %v258_v34 = vstv %s393_s20  ;;  %s395_s28 = sshll.u32 %s631_s13, 3  ;;  %s205_s13 = scalar_lea.vmem [#allocation7], %s392_s27 }
  0x3c   : > { %v238_v15 = vsub.f32 1.0, %v210_v9  ;;  %vm226_vm0 = vcmp.gt.f32.partialorder %v210_v9, 0.0  ;;  %v239_v18 = vsub.f32 1.0, %v211_v11  ;;  %vm227_vm1 = vcmp.gt.f32.partialorder %v211_v11, 0.0  ;;  %s282_s17 = scalar_lea.hbm %s786_s2, %s395_s28  ;;  %s284_s19 = sshll.u32 %s205_s13, 4  ;;  %s285_s19 = int_to_ptr.vmem [resolvable:$true] %s284_s19 }
  0x3d   : > { %453 = vtanh.f32 %v212_v2  ;;  %v256_v25 = vshrl.u32 %v255_v16, 7  ;;  %s286_s29 = sshll.u32 %s282_s17, 4  ;;  %s272_s3 = scalar_lea.sflag [#allocation4], %s732_s23  ;;  %s287_s29 = int_to_ptr.hbm [resolvable:$true] %s286_s29 }
  0x3e   : > { %455 = vtanh.f32 %v213_v3  ;;  %s535_s5 = sshra.s32 %s287_s29, 4  ;;  %s541_s25 = scalar_lea.hbm %s786_s2, 16  ;;  %s536_s5 = int_to_ptr.hbm [resolvable:$true] %s535_s5 }
  0x3f   : > { %v257_v33 = vadd.s32 8, %v256_v25  ;;  %v259_v38 = vadd.s32 %v258_v34, %v256_v25  ;;  %s537_s30 = scalar_lea.hbm %s536_s5, 8  ;;  %p542_p10 = scmp.lt.s32.totalorder %s536_s5, %s786_s2 }
  0x40   : > { %p538_p6 = scmp.ne.s32.totalorder %s536_s5, %s537_s30  ;;  %p543_p2 = scmp.lt.s32.totalorder %s541_s25, %s537_s30 }
  0x41   : > { %v260_v40 = vadd.s32 %v258_v34, %v257_v33  ;;  %vm261_vm2 = vcmp.lt.s32.totalorder %v259_v38, 32 }
  0x42   : > { %p539_p13 = pnand %p538_p6, %p660_p11  ;;  %p544_p9 = por %p543_p2, %p542_p10 }
  0x43   : > { %v454_v4 = vpop.eup %453  ;;  %vm262_vm3 = vcmp.lt.s32.totalorder %v260_v40, 32 }
  0x44   : > { %v456_v5 = vpop.eup %455  ;;  %v216_v6 = vadd.f32 1.0, %v454_v4  ;;  %p540_p3 = pneg %p539_p13 }
  0x45   : > { %v217_v7 = vadd.f32 1.0, %v456_v5 }
  0x46   : > { %v218_v8 = vmul.f32 0.5, %v216_v6  ;;  %p545_p0 = pnand %p544_p9, %p540_p3 }
  0x47   : > { %v219_v10 = vmul.f32 0.5, %v217_v7 }
  0x48   : > { %v220_v12 = vsub.f32 1.0, %v218_v8  ;;  %v236_v20 = vmul.f32 %v218_v8, %v210_v9 }
  0x49   : > { %v221_v13 = vsub.f32 1.0, %v219_v10  ;;  %v237_v22 = vmul.f32 %v219_v10, %v211_v11 }
  0x4a   : > { %v222_v14 = vadd.f32 0.05, %v220_v12 }
  0x4b   : > { %v223_v17 = vadd.f32 0.05, %v221_v13 }
  0x4c   : > { %v224_v19 = vmin.f32 %v222_v14, 1.0 }
  0x4d   : > { %v225_v21 = vmin.f32 %v223_v17, 1.0 }
  0x4e   : > { %v228_v23 = vsel %vm226_vm0, %v218_v8, %v224_v19  ;;  %v240_v24 = vmul.f32 %v238_v15, %v224_v19 }
  0x4f   : > { %v229_v26 = vsel %vm227_vm1, %v219_v10, %v225_v21  ;;  %v230_v27 = vmax.f32 %v228_v23, 1e-08  ;;  %v241_v28 = vmul.f32 %v239_v18, %v225_v21 }
  0x50   : > { %v231_v29 = vmax.f32 %v229_v26, 1e-08  ;;  %v242_v30 = vadd.f32 %v240_v24, %v236_v20 }
  0x51   : > { %457 = vlog2.f32 %v230_v27  ;;  %v243_v31 = vadd.f32 %v241_v28, %v237_v22 }
  0x52   : > { %459 = vlog2.f32 %v231_v29  ;;  %v244_v32 = vsub.f32 1.0, %v242_v30 }
  0x53   : > { %v245_v35 = vsub.f32 1.0, %v243_v31 }
  0x54   : > { %v246_v36 = vmul.f32 %v244_v32, %v244_v32 }
  0x55   : > { %v247_v37 = vmul.f32 %v245_v35, %v245_v35 }
  0x56   : > { %v248_v39 = vmul.f32 %v246_v36, %v246_v36 }
  0x57   : > { %v458_v41 = vpop.eup %457  ;;  %v249_v42 = vmul.f32 %v247_v37, %v247_v37 }
  0x58   : > { %v460_v43 = vpop.eup %459  ;;  %v233_v44 = vmul.f32 0.6931472, %v458_v41  ;;  %v250_v45 = vsel %vm226_vm0, 1.0, %v248_v39 }
  0x59   : > { %v235_v46 = vmul.f32 0.6931472, %v460_v43  ;;  %v251_v47 = vsel %vm227_vm1, 1.0, %v249_v42 }
  0x5a   : > { %v252_v48 = vmul.f32 %v250_v45, %v233_v44 }
  0x5b   : > { %v253_v49 = vmul.f32 %v251_v47, %v235_v46 }
  0x5c   : > { %v267_v50 = vsel %vm261_vm2, %v252_v48, 0.0 }
  0x5d   : > { %v268_v51 = vsel %vm262_vm3, %v253_v49, 0.0 }
  0x5e   : > { %v269_v52 = vadd.f32 %v268_v51, %v267_v50 }
  0x60   : > { %270 = vst [vmem:[%s205_s13] sm:$0xff] %v269_v52 }
  0x61   : > { %548 = shalt.err (!%p545_p0)
}
  0x62   : > { %404 = dma.vmem_to_hbm [thread:$0]  (%p660_p11), %s285_s19, 128, %s287_s29, %s272_s3  }
  0x63 PF: > { %s298_s23 = sand.u32 1, %s579_s9   ;;  %p793_p1 = scmp.ge.s32.totalorder %s591_s12, 2 }
  0x64   : > { %s299_s4 = scalar_lea.sflag [#allocation4], %s298_s23 }
  0x65   : > { %p414_p4 = pnand %p793_p1, %p664_p12 }
  0x67   : > { %p415_p7 = pneg %p414_p4 }
  0x69   : > { %574 = dma.done.wait (%p415_p7), %s299_s4, 128  }
  0x6a   : > { %576 = vsyncadd (%p415_p7), %s299_s4, 4294967168  ;;  %p18_p5 = scmp.ge.s32.totalorder %s635_s15, 4   ;;  %s794_s9 = smov %s583_s10 }
  0x6b   : > { %s795_s10 = smov %s587_s11  ;;  %s796_s11 = smov %s647_s18 }
  0x6c   : > { %s797_s12 = smov %s635_s15  ;;  %20 = sbr.rel (!%p18_p5) target bundleno = 7 (0x7), region = 86 }
  0x71   :  { %305 = vsyncpa [#allocation3], 1 }
  0x72   :  { %307 = vsyncpa [#allocation3 + $0x1], 1 }
  0x73   :  { %308 = vsyncpa [#allocation6], 1 }
  0x74   :  { %310 = vsyncpa [#allocation6 + $0x1], 1 }
  0x75   :  { %311 = vsyncpa [#allocation4], 1 }
  0x76   :  { %313 = vsyncpa [#allocation4 + $0x1], 1 }

</bundles_post_ra>
